<compile_context>
chip_gen: v7x
topology: tpu7x:2x2x1
jax: 0.10.0
libtpu: 0.0.40
codegen_flags: <defaults>
</compile_context>

<pallas_src>
import math

import jax
import jax.numpy as jnp
from jax.experimental import pallas as pl
from jax.experimental.pallas import tpu as pltpu


# --------------------------------------------------------------------------------------
# Kernels
# --------------------------------------------------------------------------------------

def _qkv_proj_kernel(qx_ref, kx_ref, vx_ref,
                     wq_ref, bq_ref, wk_ref, bk_ref, wv_ref, bv_ref,
                     qo_ref, ko_ref, vo_ref):
    """Fused Q/K/V projection over one row tile.

    qx/kx/vx_ref : (row_tile, D)   activations (compute dtype)
    wq/wk/wv_ref : (D, D)          projection weights (wq pre-scaled by 1/sqrt(d_k));
                                   constant index_map -> resident in VMEM, DMA'd once
    bq/bk/bv_ref : (1, D)          biases (f32; bq pre-scaled)
    qo/ko/vo_ref : (row_tile, D)   projected outputs (compute dtype)
    """
    def proj(x_ref, w_ref, b_ref, o_ref):
        acc = jnp.dot(x_ref[...], w_ref[...], preferred_element_type=jnp.float32)
        o_ref[...] = (acc + b_ref[...]).astype(o_ref.dtype)

    proj(qx_ref, wq_ref, bq_ref, qo_ref)
    proj(kx_ref, wk_ref, bk_ref, ko_ref)
    proj(vx_ref, wv_ref, bv_ref, vo_ref)


def _linear_kernel(x_ref, w_ref, b_ref, o_ref):
    """Row-tiled dense layer: o = x @ W + b (f32 accumulation)."""
    acc = jnp.dot(x_ref[...], w_ref[...], preferred_element_type=jnp.float32)
    o_ref[...] = (acc + b_ref[...]).astype(o_ref.dtype)


def _attn_kernel(q_ref, k_ref, v_ref, o_ref):
    """Scaled dot-product attention for all heads of one (batch, q-tile) step.

    q_ref      : (H, q_tile, d_k)  pre-projected, pre-scaled queries
    k_ref/v_ref: (H, S, d_k)       pre-projected keys / values (full K/V per batch elem)
    o_ref      : (H, q_tile, d_k)  per-head attention context
    """
    # Contraction over the last dims of q and k -> no materialized transpose.
    s = jnp.einsum('hqd,hkd->hqk', q_ref[...], k_ref[...],
                   preferred_element_type=jnp.float32)           # (H, q_tile, S)
    s = s - jnp.max(s, axis=-1, keepdims=True)                   # stable softmax
    e = jnp.exp(s)
    denom = jnp.sum(e, axis=-1, keepdims=True)
    p = e * pl.reciprocal(denom, approx=True)                    # EUP vrcp fast path
    ctx = jnp.einsum('hqk,hkd->hqd', p.astype(v_ref.dtype), v_ref[...],
                     preferred_element_type=jnp.float32)         # (H, q_tile, d_k)
    o_ref[...] = ctx.astype(o_ref.dtype)
    # TODO(synk): for very long S, add a K/V grid axis with online (flash) softmax so
    #             VMEM is O(q_tile * kv_tile) instead of O(S).


# --------------------------------------------------------------------------------------
# Wrapper
# --------------------------------------------------------------------------------------

def _largest_tile(n, preferred):
    for t in (preferred, 512, 256, 128, 64, 32, 16, 8):
        if t <= n and n % t == 0:
            return t
    return n


def _vmem_limit_bytes():
    """Per-generation scoped-VMEM budget (v5e/v6e: ~96 MiB; v7x: ~48 MiB)."""
    try:
        cap = pltpu.get_tpu_info().vmem_capacity_bytes
    except Exception:
        cap = 64 * 1024 * 1024
    return min((3 * cap) // 4, 96 * 1024 * 1024)


def multi_headed_attention(query, key, value, params, *, num_heads,
                           q_tile=None, compute_dtype=jnp.bfloat16):
    """Pallas MHA forward.  query/key/value: (B, S, D) float32.

    params = (wq, bq, wk, bk, wv, bv, wo, bo) with weights stored (in, out).
    compute_dtype: MXU operand dtype (bf16 recommended; accumulation is always f32).
    """
    B, S, D = query.shape
    assert key.shape == (B, S, D) and value.shape == (B, S, D)
    assert D % num_heads == 0
    d_k = D // num_heads
    out_dtype = query.dtype

    if q_tile is None:
        q_tile = S if S <= 256 else _largest_tile(S, 256)
    assert S % q_tile == 0
    assert q_tile == S or q_tile % 8 == 0

    rows = B * S
    row_tile = rows if rows <= 512 else _largest_tile(rows, 512)
    assert rows % row_tile == 0
    assert row_tile == rows or row_tile % 8 == 0

    wq, bq, wk, bk, wv, bv, wo, bo = params
    scale = 1.0 / math.sqrt(d_k)

    # Fold the softmax scale into the Q projection; cast MXU operands to compute dtype.
    wq_c = (wq * scale).astype(compute_dtype)
    bq_2 = (bq * scale).reshape(1, D).astype(jnp.float32)
    wk_c = wk.astype(compute_dtype)
    bk_2 = bk.reshape(1, D).astype(jnp.float32)
    wv_c = wv.astype(compute_dtype)
    bv_2 = bv.reshape(1, D).astype(jnp.float32)
    wo_c = wo.astype(compute_dtype)
    bo_2 = bo.reshape(1, D).astype(jnp.float32)

    qx = query.reshape(rows, D).astype(compute_dtype)
    kx = key.reshape(rows, D).astype(compute_dtype)
    vx = value.reshape(rows, D).astype(compute_dtype)
    # TODO(synk): when query/key/value alias (self-attention), a single-input fused
    #             projection kernel would avoid DMA-ing the same activations 3x.

    vmem_limit = _vmem_limit_bytes()

    row_spec = pl.BlockSpec((row_tile, D), lambda i: (i, 0))
    w_spec = pl.BlockSpec((D, D), lambda i: (0, 0))       # constant -> DMA'd once
    b_spec = pl.BlockSpec((1, D), lambda i: (0, 0))

    # --- 1) Fused Q/K/V projection (dense GEMMs, weights resident in VMEM). ---
    q_p, k_p, v_p = pl.pallas_call(
        _qkv_proj_kernel,
        out_shape=(jax.ShapeDtypeStruct((rows, D), compute_dtype),
                   jax.ShapeDtypeStruct((rows, D), compute_dtype),
                   jax.ShapeDtypeStruct((rows, D), compute_dtype)),
        grid=(rows // row_tile,),
        in_specs=[row_spec, row_spec, row_spec,
                  w_spec, b_spec,    # q projection (pre-scaled)
                  w_spec, b_spec,    # k projection
                  w_spec, b_spec],   # v projection
        out_specs=(row_spec, row_spec, row_spec),
        compiler_params=pltpu.CompilerParams(
            dimension_semantics=("parallel",),
            vmem_limit_bytes=vmem_limit),
    )(qx, kx, vx, wq_c, bq_2, wk_c, bk_2, wv_c, bv_2)

    # Layout plumbing only (XLA): (B*S, D) -> (B, H, S, d_k).
    def to_bhsd(x):
        return x.reshape(B, S, num_heads, d_k).transpose(0, 2, 1, 3)

    q_h, k_h, v_h = to_bhsd(q_p), to_bhsd(k_p), to_bhsd(v_p)

    # --- 2) Attention: all heads per grid step; both grid axes fully parallel. ---
    attn_q_spec = pl.BlockSpec((None, num_heads, q_tile, d_k),
                               lambda b, qt: (b, 0, qt, 0))
    attn_kv_spec = pl.BlockSpec((None, num_heads, S, d_k),
                                lambda b, qt: (b, 0, 0, 0))

    ctx = pl.pallas_call(
        _attn_kernel,
        out_shape=jax.ShapeDtypeStruct((B, num_heads, S, d_k), compute_dtype),
        grid=(B, S // q_tile),
        in_specs=[attn_q_spec, attn_kv_spec, attn_kv_spec],
        out_specs=attn_q_spec,
        compiler_params=pltpu.CompilerParams(
            dimension_semantics=("parallel", "parallel"),
            vmem_limit_bytes=vmem_limit),
    )(q_h, k_h, v_h)

    # Layout plumbing only (XLA): (B, H, S, d_k) -> (B*S, D) lane-dense slab.
    ctx_2d = ctx.transpose(0, 2, 1, 3).reshape(rows, D)

    # --- 3) Output projection (dense GEMM over lane-dense context). ---
    out = pl.pallas_call(
        _linear_kernel,
        out_shape=jax.ShapeDtypeStruct((rows, D), out_dtype),
        grid=(rows // row_tile,),
        in_specs=[row_spec, w_spec, b_spec],
        out_specs=row_spec,
        compiler_params=pltpu.CompilerParams(
            dimension_semantics=("parallel",),
            vmem_limit_bytes=vmem_limit),
    )(ctx_2d, wo_c, bo_2)

    return out.reshape(B, S, D)


# --------------------------------------------------------------------------------------
# Plain-JAX reference (mirrors the PyTorch forward with mask/gate/coverage/gold_attn off)
# --------------------------------------------------------------------------------------

def _reference(query, key, value, params, *, num_heads):
    B, S, D = query.shape
    d_k = D // num_heads
    wq, bq, wk, bk, wv, bv, wo, bo = params

    def proj(x, w, b):
        return (x @ w + b).reshape(B, S, num_heads, d_k).transpose(0, 2, 1, 3)

    q = proj(query, wq, bq)
    k = proj(key, wk, bk)
    v = proj(value, wv, bv)
    scores = jnp.einsum('bhqd,bhkd->bhqk', q, k) / math.sqrt(d_k)
    p = jax.nn.softmax(scores, axis=-1)
    ctx = jnp.einsum('bhqk,bhkd->bhqd', p, v)
    ctx = ctx.transpose(0, 2, 1, 3).reshape(B, S, D)
    return ctx @ wo + bo


if __name__ == "__main__":
    B, S, D, H = 2, 16, 32, 4   # batch, seq, d_model, heads  (d_k = 8)
    Q_TILE = 8                  # 2 query tiles per batch element

    key0 = jax.random.PRNGKey(0)
    keys = jax.random.split(key0, 12)

    query = jax.random.normal(keys[0], (B, S, D), dtype=jnp.float32)
    key_x = jax.random.normal(keys[1], (B, S, D), dtype=jnp.float32)
    value = jax.random.normal(keys[2], (B, S, D), dtype=jnp.float32)

    def init_linear(kw, kb):
        # deterministic init ~ PyTorch Linear default range (uniform in +/- 1/sqrt(D))
        bound = 1.0 / math.sqrt(D)
        w = jax.random.uniform(kw, (D, D), jnp.float32, -bound, bound)
        b = jax.random.uniform(kb, (D,), jnp.float32, -bound, bound)
        return w, b

    wq, bq = init_linear(keys[3], keys[4])
    wk, bk = init_linear(keys[5], keys[6])
    wv, bv = init_linear(keys[7], keys[8])
    wo, bo = init_linear(keys[9], keys[10])
    params = (wq, bq, wk, bk, wv, bv, wo, bo)

    ref = _reference(query, key_x, value, params, num_heads=H)

    # f32 MXU operands (tight-ish tolerance; approx reciprocal in the softmax).
    out_f32 = multi_headed_attention(query, key_x, value, params, num_heads=H,
                                     q_tile=Q_TILE, compute_dtype=jnp.float32)
    out_f32 = jax.block_until_ready(out_f32)
    assert out_f32.shape == (B, S, D)
    assert jnp.allclose(out_f32, ref, atol=1e-2, rtol=1e-2), "f32 mismatch vs reference"

    # bf16 MXU operands with f32 accumulation (recommended perf setting; looser tol).
    out_bf16 = multi_headed_attention(query, key_x, value, params, num_heads=H,
                                      q_tile=Q_TILE, compute_dtype=jnp.bfloat16)
    out_bf16 = jax.block_until_ready(out_bf16)
    assert out_bf16.shape == (B, S, D)
    assert jnp.allclose(out_bf16, ref, atol=5e-2, rtol=5e-2), "bf16 mismatch vs reference"

    print("KERNEL_OK")
</pallas_src>

<mosaic_0001>
module attributes {stable_mosaic.version = 11 : i64} {
  func.func @_qkv_proj_kernel(%arg0: i32, %arg1: memref<32x32xf32, #tpu.memory_space<vmem>>, %arg2: memref<32x32xf32, #tpu.memory_space<vmem>>, %arg3: memref<32x32xf32, #tpu.memory_space<vmem>>, %arg4: memref<32x32xf32, #tpu.memory_space<vmem>>, %arg5: memref<1x32xf32, #tpu.memory_space<vmem>>, %arg6: memref<32x32xf32, #tpu.memory_space<vmem>>, %arg7: memref<1x32xf32, #tpu.memory_space<vmem>>, %arg8: memref<32x32xf32, #tpu.memory_space<vmem>>, %arg9: memref<1x32xf32, #tpu.memory_space<vmem>>, %arg10: memref<32x32xf32, #tpu.memory_space<vmem>>, %arg11: memref<32x32xf32, #tpu.memory_space<vmem>>, %arg12: memref<32x32xf32, #tpu.memory_space<vmem>>) attributes {dimension_semantics = [#tpu.dimension_semantics<parallel>], iteration_bounds = array<i64: 1>, scalar_prefetch = 0 : i64, scratch_operands = 0 : i64, tpu.core_type = #tpu.core_type<tc>, window_params = [{transform_indices = @transform_0, window_bounds = array<i64: 32, 32>}, {transform_indices = @transform_1, window_bounds = array<i64: 32, 32>}, {transform_indices = @transform_2, window_bounds = array<i64: 32, 32>}, {pipeline_mode = #tpu.pipeline_mode<synchronous>, transform_indices = @transform_3, window_bounds = array<i64: 32, 32>}, {pipeline_mode = #tpu.pipeline_mode<synchronous>, transform_indices = @transform_4, window_bounds = array<i64: 1, 32>}, {pipeline_mode = #tpu.pipeline_mode<synchronous>, transform_indices = @transform_5, window_bounds = array<i64: 32, 32>}, {pipeline_mode = #tpu.pipeline_mode<synchronous>, transform_indices = @transform_6, window_bounds = array<i64: 1, 32>}, {pipeline_mode = #tpu.pipeline_mode<synchronous>, transform_indices = @transform_7, window_bounds = array<i64: 32, 32>}, {pipeline_mode = #tpu.pipeline_mode<synchronous>, transform_indices = @transform_8, window_bounds = array<i64: 1, 32>}, {transform_indices = @transform_9, window_bounds = array<i64: 32, 32>}, {transform_indices = @transform_10, window_bounds = array<i64: 32, 32>}, {transform_indices = @transform_11, window_bounds = array<i64: 32, 32>}]} {
    %c0 = arith.constant 0 : index
    %c0_0 = arith.constant 0 : index
    %0 = vector.load %arg1[%c0, %c0_0] : memref<32x32xf32, #tpu.memory_space<vmem>>, vector<32x32xf32>
    %c0_1 = arith.constant 0 : index
    %c0_2 = arith.constant 0 : index
    %1 = vector.load %arg4[%c0_1, %c0_2] : memref<32x32xf32, #tpu.memory_space<vmem>>, vector<32x32xf32>
    %cst = arith.constant dense<0.000000e+00> : vector<32x32xf32>
    %2 = tpu.matmul %0, %1, %cst {dimension_numbers = #tpu.dot_dimension_numbers<[1], [0], [0], [1], [0, 0, 1, 1], [], []>} : vector<32x32xf32>, vector<32x32xf32>, vector<32x32xf32> -> vector<32x32xf32>
    %c0_3 = arith.constant 0 : index
    %c0_4 = arith.constant 0 : index
    %3 = vector.load %arg5[%c0_3, %c0_4] : memref<1x32xf32, #tpu.memory_space<vmem>>, vector<1x32xf32>
    %4 = vector.broadcast %3 : vector<1x32xf32> to vector<32x32xf32>
    %5 = arith.addf %2, %4 : vector<32x32xf32>
    %c0_5 = arith.constant 0 : index
    %c0_6 = arith.constant 0 : index
    %6 = vector.load %arg10[%c0_5, %c0_6] : memref<32x32xf32, #tpu.memory_space<vmem>>, vector<32x32xf32>
    tpu.vector_store %arg10[%c0_5, %c0_6], %5 {strides = array<i32>} : memref<32x32xf32, #tpu.memory_space<vmem>>, vector<32x32xf32>,
    %c0_7 = arith.constant 0 : index
    %c0_8 = arith.constant 0 : index
    %7 = vector.load %arg2[%c0_7, %c0_8] : memref<32x32xf32, #tpu.memory_space<vmem>>, vector<32x32xf32>
    %c0_9 = arith.constant 0 : index
    %c0_10 = arith.constant 0 : index
    %8 = vector.load %arg6[%c0_9, %c0_10] : memref<32x32xf32, #tpu.memory_space<vmem>>, vector<32x32xf32>
    %cst_11 = arith.constant dense<0.000000e+00> : vector<32x32xf32>
    %9 = tpu.matmul %7, %8, %cst_11 {dimension_numbers = #tpu.dot_dimension_numbers<[1], [0], [0], [1], [0, 0, 1, 1], [], []>} : vector<32x32xf32>, vector<32x32xf32>, vector<32x32xf32> -> vector<32x32xf32>
    %c0_12 = arith.constant 0 : index
    %c0_13 = arith.constant 0 : index
    %10 = vector.load %arg7[%c0_12, %c0_13] : memref<1x32xf32, #tpu.memory_space<vmem>>, vector<1x32xf32>
    %11 = vector.broadcast %10 : vector<1x32xf32> to vector<32x32xf32>
    %12 = arith.addf %9, %11 : vector<32x32xf32>
    %c0_14 = arith.constant 0 : index
    %c0_15 = arith.constant 0 : index
    %13 = vector.load %arg11[%c0_14, %c0_15] : memref<32x32xf32, #tpu.memory_space<vmem>>, vector<32x32xf32>
    tpu.vector_store %arg11[%c0_14, %c0_15], %12 {strides = array<i32>} : memref<32x32xf32, #tpu.memory_space<vmem>>, vector<32x32xf32>,
    %c0_16 = arith.constant 0 : index
    %c0_17 = arith.constant 0 : index
    %14 = vector.load %arg3[%c0_16, %c0_17] : memref<32x32xf32, #tpu.memory_space<vmem>>, vector<32x32xf32>
    %c0_18 = arith.constant 0 : index
    %c0_19 = arith.constant 0 : index
    %15 = vector.load %arg8[%c0_18, %c0_19] : memref<32x32xf32, #tpu.memory_space<vmem>>, vector<32x32xf32>
    %cst_20 = arith.constant dense<0.000000e+00> : vector<32x32xf32>
    %16 = tpu.matmul %14, %15, %cst_20 {dimension_numbers = #tpu.dot_dimension_numbers<[1], [0], [0], [1], [0, 0, 1, 1], [], []>} : vector<32x32xf32>, vector<32x32xf32>, vector<32x32xf32> -> vector<32x32xf32>
    %c0_21 = arith.constant 0 : index
    %c0_22 = arith.constant 0 : index
    %17 = vector.load %arg9[%c0_21, %c0_22] : memref<1x32xf32, #tpu.memory_space<vmem>>, vector<1x32xf32>
    %18 = vector.broadcast %17 : vector<1x32xf32> to vector<32x32xf32>
    %19 = arith.addf %16, %18 : vector<32x32xf32>
    %c0_23 = arith.constant 0 : index
    %c0_24 = arith.constant 0 : index
    %20 = vector.load %arg12[%c0_23, %c0_24] : memref<32x32xf32, #tpu.memory_space<vmem>>, vector<32x32xf32>
    tpu.vector_store %arg12[%c0_23, %c0_24], %19 {strides = array<i32>} : memref<32x32xf32, #tpu.memory_space<vmem>>, vector<32x32xf32>,
    return
  }
  func.func @transform_0(%arg0: i32) -> (i32, i32) {
    %c0_i32 = arith.constant 0 : i32
    %c0_i32_0 = arith.constant 0 : i32
    return %arg0, %c0_i32 : i32, i32
  }
  func.func @transform_1(%arg0: i32) -> (i32, i32) {
    %c0_i32 = arith.constant 0 : i32
    %c0_i32_0 = arith.constant 0 : i32
    return %arg0, %c0_i32 : i32, i32
  }
  func.func @transform_2(%arg0: i32) -> (i32, i32) {
    %c0_i32 = arith.constant 0 : i32
    %c0_i32_0 = arith.constant 0 : i32
    return %arg0, %c0_i32 : i32, i32
  }
  func.func @transform_3(%arg0: i32) -> (i32, i32) {
    %c0_i32 = arith.constant 0 : i32
    %c0_i32_0 = arith.constant 0 : i32
    %c0_i32_1 = arith.constant 0 : i32
    return %c0_i32, %c0_i32_0 : i32, i32
  }
  func.func @transform_4(%arg0: i32) -> (i32, i32) {
    %c0_i32 = arith.constant 0 : i32
    %c0_i32_0 = arith.constant 0 : i32
    %c0_i32_1 = arith.constant 0 : i32
    return %c0_i32, %c0_i32_0 : i32, i32
  }
  func.func @transform_5(%arg0: i32) -> (i32, i32) {
    %c0_i32 = arith.constant 0 : i32
    %c0_i32_0 = arith.constant 0 : i32
    %c0_i32_1 = arith.constant 0 : i32
    return %c0_i32, %c0_i32_0 : i32, i32
  }
  func.func @transform_6(%arg0: i32) -> (i32, i32) {
    %c0_i32 = arith.constant 0 : i32
    %c0_i32_0 = arith.constant 0 : i32
    %c0_i32_1 = arith.constant 0 : i32
    return %c0_i32, %c0_i32_0 : i32, i32
  }
  func.func @transform_7(%arg0: i32) -> (i32, i32) {
    %c0_i32 = arith.constant 0 : i32
    %c0_i32_0 = arith.constant 0 : i32
    %c0_i32_1 = arith.constant 0 : i32
    return %c0_i32, %c0_i32_0 : i32, i32
  }
  func.func @transform_8(%arg0: i32) -> (i32, i32) {
    %c0_i32 = arith.constant 0 : i32
    %c0_i32_0 = arith.constant 0 : i32
    %c0_i32_1 = arith.constant 0 : i32
    return %c0_i32, %c0_i32_0 : i32, i32
  }
  func.func @transform_9(%arg0: i32) -> (i32, i32) {
    %c0_i32 = arith.constant 0 : i32
    %c0_i32_0 = arith.constant 0 : i32
    return %arg0, %c0_i32 : i32, i32
  }
  func.func @transform_10(%arg0: i32) -> (i32, i32) {
    %c0_i32 = arith.constant 0 : i32
    %c0_i32_0 = arith.constant 0 : i32
    return %arg0, %c0_i32 : i32, i32
  }
  func.func @transform_11(%arg0: i32) -> (i32, i32) {
    %c0_i32 = arith.constant 0 : i32
    %c0_i32_0 = arith.constant 0 : i32
    return %arg0, %c0_i32 : i32, i32
  }
}

</mosaic_0001>

<bundles_post_ra>
// kernel: tpu_custom_call.1
= control target key start
LH: loop header
LB: loop body
LE: loop exit
PB: predicated region body
PF: predicated region fallthrough
CT: control target
= control target key end

     0   :  { %17 = vsyncpa [#allocation3], 0  ;;  %s1119_s0 = inlined_call_operand.hbm [shape: f32[32,32], index: 0, kind: input, shape index: {}]   ;;  %s1120_s1 = inlined_call_operand.hbm [shape: f32[32,32], index: 1, kind: input, shape index: {}]   ;;  %s1121_s2 = inlined_call_operand.hbm [shape: f32[32,32], index: 2, kind: input, shape index: {}]   ;;  %s1122_s3 = inlined_call_operand.hbm [shape: f32[32,32], index: 3, kind: input, shape index: {}]   ;;  %s1123_s4 = inlined_call_operand.vmem [shape: f32[1,32], index: 4, kind: input, shape index: {}]   ;;  %s1124_s5 = inlined_call_operand.hbm [shape: f32[32,32], index: 5, kind: input, shape index: {}]   ;;  %s1125_s6 = inlined_call_operand.vmem [shape: f32[1,32], index: 6, kind: input, shape index: {}]   ;;  %s1126_s7 = inlined_call_operand.hbm [shape: f32[32,32], index: 7, kind: input, shape index: {}]   ;;  %s1127_s8 = inlined_call_operand.vmem [shape: f32[1,32], index: 8, kind: input, shape index: {}]   ;;  %s1128_s9 = inlined_call_operand.hbm [shape: f32[32,32], index: 9, kind: output, shape index: {0}]   ;;  %s1129_s10 = inlined_call_operand.hbm [shape: f32[32,32], index: 10, kind: output, shape index: {1}]   ;;  %s1130_s11 = inlined_call_operand.hbm [shape: f32[32,32], index: 11, kind: output, shape index: {2}]  }
   0x1   :  { %18 = vsyncpa [#allocation6], 0 }
   0x2   :  { %19 = vsyncpa [#allocation9], 0 }
   0x3   :  { %20 = vsyncpa [#allocation12], 0 }
   0x4   :  { %21 = vsyncpa [#allocation4], 0 }
   0x5   :  { %22 = vsyncpa [#allocation15], 0  ;;  %s849_s17 = smov [#allocation5]   ;;  %s850_s19 = smov [#allocation8]  }
   0x6   :  { %s40_s18 = sshll.u32 %s849_s17, 4  ;;  %s64_s20 = sshll.u32 %s850_s19, 4  ;;  %s41_s18 = int_to_ptr.vmem [resolvable:$true] %s40_s18  ;;  %s920_s20 = int_to_ptr.vmem [resolvable:$true] %s64_s20 }
   0x7   :  { %s639_s23 = scalar_lea.hbm %s1120_s1, 512 }
   0x8   :  { %p640_p0 = scmp.ne.s32.totalorder %s1120_s1, %s639_s23  ;;  %p643_p1 = scmp.lt.u32.totalorder %s639_s23, %s1120_s1 }
   0xa   :  { %p645_p2 = pnand %p643_p1, %p640_p0 }
   0xc   :  { %648 = shalt.err (!%p645_p2)
}
   0xd   :  { %s649_s28 = scalar_lea.vmem %s41_s18, 512  ;;  %p654_p4 = scmp.lt.s32.totalorder %s41_s18, %s41_s18 }
   0xe   :  { %p650_p3 = scmp.ne.s32.totalorder %s41_s18, %s649_s28  ;;  %p655_p5 = scmp.lt.s32.totalorder %s649_s28, %s649_s28 }
  0x10   :  { %p656_p6 = por %p655_p5, %p654_p4 }
  0x12   :  { %p657_p7 = pnand %p656_p6, %p650_p3 }
  0x14   :  { %660 = shalt.err (!%p657_p7)
}
  0x15   :  { %s851_s29 = smov 128   ;;  %s852_s30 = smov 8  }
  0x16   :  { %46 = dma.hbm_to_vmem [thread:$0]  %s1120_s1, 512, %s41_s18, [#allocation6], %s851_s29, %s851_s29, %s852_s30  }
  0x17   :  { %s661_s16 = scalar_lea.hbm %s1122_s3, 512 }
  0x18   :  { %p662_p8 = scmp.ne.s32.totalorder %s1122_s3, %s661_s16  ;;  %p665_p9 = scmp.lt.u32.totalorder %s661_s16, %s1122_s3 }
  0x1a   :  { %p667_p10 = pnand %p665_p9, %p662_p8 }
  0x1c   :  { %670 = shalt.err (!%p667_p10)
}
  0x1d   :  { %s671_s23 = scalar_lea.vmem %s920_s20, 512  ;;  %p676_p12 = scmp.lt.s32.totalorder %s920_s20, %s920_s20 }
  0x1e   :  { %p672_p11 = scmp.ne.s32.totalorder %s920_s20, %s671_s23  ;;  %p677_p13 = scmp.lt.s32.totalorder %s671_s23, %s671_s23 }
  0x20   :  { %p678_p0 = por %p677_p13, %p676_p12 }
  0x22   :  { %p679_p1 = pnand %p678_p0, %p672_p11 }
  0x24   :  { %682 = shalt.err (!%p679_p1)
}
  0x25   :  { %70 = dma.hbm_to_vmem [thread:$0]  %s1122_s3, 512, %s920_s20, [#allocation9], %s851_s29, %s851_s29, %s852_s30  }
  0x26   :  { %s853_s24 = smov [#allocation2]   ;;  %s854_s26 = smov [#allocation7]  }
  0x27   :  { %s28_s25 = sshll.u32 %s853_s24, 4  ;;  %s52_s27 = sshll.u32 %s854_s26, 4  ;;  %s29_s25 = int_to_ptr.vmem [resolvable:$true] %s28_s25  ;;  %s957_s27 = int_to_ptr.vmem [resolvable:$true] %s52_s27 }
  0x28   :  { %s683_s13 = scalar_lea.hbm %s1119_s0, 512 }
  0x29   :  { %p684_p2 = scmp.ne.s32.totalorder %s1119_s0, %s683_s13  ;;  %p687_p3 = scmp.lt.u32.totalorder %s683_s13, %s1119_s0 }
  0x2b   :  { %p689_p4 = pnand %p687_p3, %p684_p2 }
  0x2d   :  { %692 = shalt.err (!%p689_p4)
}
  0x2e   :  { %s693_s3 = scalar_lea.vmem %s29_s25, 512  ;;  %p698_p6 = scmp.lt.s32.totalorder %s29_s25, %s29_s25 }
  0x2f   :  { %p694_p5 = scmp.ne.s32.totalorder %s29_s25, %s693_s3  ;;  %p699_p7 = scmp.lt.s32.totalorder %s693_s3, %s693_s3 }
  0x31   :  { %p700_p8 = por %p699_p7, %p698_p6 }
  0x33   :  { %p701_p9 = pnand %p700_p8, %p694_p5 }
  0x35   :  { %704 = shalt.err (!%p701_p9)
}
  0x36   :  { %34 = dma.hbm_to_vmem [thread:$0]  %s1119_s0, 512, %s29_s25, [#allocation3], %s851_s29, %s851_s29, %s852_s30  }
  0x37   :  { %s705_s23 = scalar_lea.hbm %s1121_s2, 512 }
  0x38   :  { %p706_p10 = scmp.ne.s32.totalorder %s1121_s2, %s705_s23  ;;  %p709_p11 = scmp.lt.u32.totalorder %s705_s23, %s1121_s2 }
  0x3a   :  { %p711_p12 = pnand %p709_p11, %p706_p10 }
  0x3c   :  { %714 = shalt.err (!%p711_p12)
}
  0x3d   :  { %s715_s28 = scalar_lea.vmem %s957_s27, 512  ;;  %p720_p0 = scmp.lt.s32.totalorder %s957_s27, %s957_s27 }
  0x3e   :  { %p716_p13 = scmp.ne.s32.totalorder %s957_s27, %s715_s28  ;;  %p721_p1 = scmp.lt.s32.totalorder %s715_s28, %s715_s28 }
  0x40   :  { %p722_p2 = por %p721_p1, %p720_p0 }
  0x42   :  { %p723_p3 = pnand %p722_p2, %p716_p13 }
  0x44   :  { %726 = shalt.err (!%p723_p3)
}
  0x45   :  { %58 = dma.hbm_to_vmem [thread:$0]  %s1121_s2, 512, %s957_s27, [#allocation6], %s851_s29, %s851_s29, %s852_s30  }
  0x46   :  { %s855_s12 = smov [#allocation10]   ;;  %s856_s14 = smov [#allocation11]  }
  0x47   :  { %s78_s13 = sshll.u32 %s855_s12, 4  ;;  %s92_s15 = sshll.u32 %s856_s14, 4  ;;  %s79_s13 = int_to_ptr.vmem [resolvable:$true] %s78_s13  ;;  %s994_s15 = int_to_ptr.vmem [resolvable:$true] %s92_s15 }
  0x48   :  { %s727_s3 = scalar_lea.hbm %s1124_s5, 512 }
  0x49   :  { %p728_p4 = scmp.ne.s32.totalorder %s1124_s5, %s727_s3  ;;  %p731_p5 = scmp.lt.u32.totalorder %s727_s3, %s1124_s5 }
  0x4b   :  { %p733_p6 = pnand %p731_p5, %p728_p4 }
  0x4d   :  { %736 = shalt.err (!%p733_p6)
}
  0x4e   :  { %s737_s2 = scalar_lea.vmem %s79_s13, 512  ;;  %p742_p8 = scmp.lt.s32.totalorder %s79_s13, %s79_s13 }
  0x4f   :  { %p738_p7 = scmp.ne.s32.totalorder %s79_s13, %s737_s2  ;;  %p743_p9 = scmp.lt.s32.totalorder %s737_s2, %s737_s2 }
  0x51   :  { %p744_p10 = por %p743_p9, %p742_p8 }
  0x53   :  { %p745_p11 = pnand %p744_p10, %p738_p7 }
  0x55   :  { %748 = shalt.err (!%p745_p11)
}
  0x56   :  { %84 = dma.hbm_to_vmem [thread:$0]  %s1124_s5, 512, %s79_s13, [#allocation9], %s851_s29, %s851_s29, %s852_s30  }
  0x57   :  { %s749_s24 = scalar_lea.hbm %s1126_s7, 512 }
  0x58   :  { %p750_p12 = scmp.ne.s32.totalorder %s1126_s7, %s749_s24  ;;  %p753_p13 = scmp.lt.u32.totalorder %s749_s24, %s1126_s7 }
  0x5a   :  { %p755_p0 = pnand %p753_p13, %p750_p12 }
  0x5c   :  { %758 = shalt.err (!%p755_p0)
}
  0x5d   :  { %s759_s12 = scalar_lea.vmem %s994_s15, 512  ;;  %p764_p2 = scmp.lt.s32.totalorder %s994_s15, %s994_s15 }
  0x5e   :  { %p760_p1 = scmp.ne.s32.totalorder %s994_s15, %s759_s12  ;;  %p765_p3 = scmp.lt.s32.totalorder %s759_s12, %s759_s12 }
  0x60   :  { %p766_p4 = por %p765_p3, %p764_p2 }
  0x62   :  { %p767_p5 = pnand %p766_p4, %p760_p1 }
  0x64   :  { %770 = shalt.err (!%p767_p5)
}
  0x65   :  { %98 = dma.hbm_to_vmem [thread:$0]  %s1126_s7, 512, %s994_s15, [#allocation12], %s851_s29, %s851_s29, %s852_s30  }
  0x66   :  { %837 = dma.done.wait [#allocation3], 512  }
  0x67   :  { %838 = vsyncadd [#allocation3], 4294966784 }
  0x68   :  { %839 = dma.done.wait [#allocation6], 1024  }
  0x69   :  { %840 = vsyncadd [#allocation6], 4294966272 }
  0x6a   :  { %841 = dma.done.wait [#allocation9], 1024  }
  0x6b   :  { %842 = vsyncadd [#allocation9], 4294966272 }
  0x6c   :  { %843 = dma.done.wait [#allocation12], 512  }
  0x6d   :  { %844 = vsyncadd [#allocation12], 4294966784  ;;  %v123_v0 = vld [vmem:[#allocation8] sm:$0xff]  ;;  %v124_v1 = vld [vmem:[#allocation8 + $0x8] sm:$0xff]  ;;  %vm134_vm0 = vcmask 261120   ;;  %s857_s17 = smov [#allocation13]  }
  0x6e   :  { %v240_v2 = vld [vmem:[#allocation10] sm:$0xff]  ;;  %v600_v3 = vpack.c.bf16 %v124_v1, %v123_v0  ;;  %v241_v4 = vld [vmem:[#allocation10 + $0x8] sm:$0xff]  ;;  %v125_v5 = vld [vmem:[#allocation8 + $0x10] sm:$0xff]  ;;  %s473_s3 = sshll.u32 %s857_s17, 4  ;;  %s859_s21 = smov [#allocation16]   ;;  %s474_s3 = int_to_ptr.vmem [resolvable:$true] %s473_s3 }
  0x6f   :  { %v126_v6 = vld [vmem:[#allocation8 + $0x18] sm:$0xff]  ;;  %v608_v7 = vpack.c.bf16 %v241_v4, %v240_v2  ;;  %v242_v9 = vld [vmem:[#allocation10 + $0x10] sm:$0xff]  ;;  %v119_v11 = vld [vmem:[#allocation2] sm:$0xff]  ;;  %s1061_s22 = sshll.u32 %s859_s21, 4  ;;  %p776_p7 = scmp.lt.s32.totalorder %s474_s3, %s474_s3  ;;  %s498_s22 = int_to_ptr.vmem [resolvable:$true] %s1061_s22 }
  0x70   :  { %v604_v8 = vpack.c.bf16 %v126_v6, %v125_v5  ;;  %v243_v10 = vld [vmem:[#allocation10 + $0x18] sm:$0xff]  ;;  %601 = vmatprep.subr.bf16.mxu0 %v600_v3  ;;  %566 = vmatprep.mubr.msk.f32.mxu0 %vm134_vm0, %v119_v11  ;;  %v236_v13 = vld [vmem:[#allocation5] sm:$0xff]  ;;  %v357_v15 = vld [vmem:[#allocation11 + $0x8] sm:$0xff] }
  0x71   :  { %v612_v12 = vpack.c.bf16 %v243_v10, %v242_v9  ;;  %609 = vmatprep.subr.bf16.mxu1 %v608_v7  ;;  %603 = vmatpush3.bf16.msra.mxu0 %v600_v3  ;;  %v356_v14 = vld [vmem:[#allocation11] sm:$0xff]  ;;  %v358_v17 = vld [vmem:[#allocation11 + $0x10] sm:$0xff]  ;;  %v359_v18 = vld [vmem:[#allocation11 + $0x18] sm:$0xff] }
  0x72   :  { %611 = vmatpush3.bf16.msra.mxu1 %v608_v7  ;;  %605 = vmatprep.subr.bf16.mxu0 %v604_v8  ;;  %v616_v16 = vpack.c.bf16 %v357_v15, %v356_v14  ;;  %v120_v19 = vld [vmem:[#allocation2 + $0x8] sm:$0xff]  ;;  %v121_v21 = vld [vmem:[#allocation2 + $0x10] sm:$0xff]  ;;  %v620_v22 = vpack.c.bf16 %v359_v18, %v358_v17  ;;  %v122_v24 = vld [vmem:[#allocation2 + $0x18] sm:$0xff] }
  0x73   :  { %613 = vmatprep.subr.bf16.mxu1 %v612_v12  ;;  %580 = vmatprep.mubr.msk.f32.mxu1 %vm134_vm0, %v236_v13  ;;  %v237_v20 = vld [vmem:[#allocation5 + $0x8] sm:$0xff]  ;;  %v238_v23 = vld [vmem:[#allocation5 + $0x10] sm:$0xff]  ;;  %v239_v25 = vld [vmem:[#allocation5 + $0x18] sm:$0xff] }
  0x74   :  { %v352_v26 = vld [vmem:[#allocation7] sm:$0xff]  ;;  %v354_v27 = vld [vmem:[#allocation7 + $0x10] sm:$0xff]  ;;  %v353_v28 = vld [vmem:[#allocation7 + $0x8] sm:$0xff] }
  0x75   :  { %607 = vmatpush3.bf16.msra.mxu0 %v604_v8  ;;  %v355_v29 = vld [vmem:[#allocation7 + $0x18] sm:$0xff]  ;;  %v519_v30 = vld [vmem:[%s1123_s4] ss:$0 sm:$0xff]  ;;  %s858_s4 = smov [#allocation14]  }
  0x76   :  { %615 = vmatpush3.bf16.msra.mxu1 %v612_v12  ;;  %617 = vmatprep.subr.bf16.mxu0 %v616_v16  ;;  %v524_v31 = vld [vmem:[%s1125_s6] ss:$0 sm:$0xff]  ;;  %s485_s20 = sshll.u32 %s858_s4, 4  ;;  %s1057_s20 = int_to_ptr.vmem [resolvable:$true] %s485_s20 }
  0x77   :  { %624 = vmatprep.subr.bf16.mxu1 %v616_v16  ;;  %v529_v47 = vld [vmem:[%s1127_s8] ss:$0 sm:$0xff]  ;;  %s771_s8 = scalar_lea.vmem %s474_s3, 512 }
  0x78   :  { %567 = vmatmul.mubr.msk.f32.vlgmr.msra.gmra.mrb[0].mxu0 %vm134_vm0, %v120_v19  ;;  %p772_p6 = scmp.ne.s32.totalorder %s474_s3, %s771_s8  ;;  %p777_p8 = scmp.lt.s32.totalorder %s771_s8, %s771_s8 }
  0x79   :  { %581 = vmatmul.mubr.msk.f32.vlgmr.msra.gmra.mrb[0].mxu1 %vm134_vm0, %v237_v20  ;;  %619 = vmatpush3.bf16.msra.mxu0 %v616_v16 }
  0x7a   :  { %626 = vmatpush3.bf16.msra.mxu1 %v616_v16  ;;  %569 = vmatprep.mubr.msk.f32.mxu0 %vm134_vm0, %v121_v21  ;;  %p778_p9 = por %p777_p8, %p776_p7 }
  0x7b   :  { %583 = vmatprep.mubr.msk.f32.mxu1 %vm134_vm0, %v238_v23  ;;  %621 = vmatprep.subr.bf16.mxu0 %v620_v22 }
  0x7c   :  { %570 = vmatmul.mubr.msk.f32.gmra.mrb[2].mxu0 %vm134_vm0, %v122_v24  ;;  %625 = vmatprep.subr.bf16.mxu1 %v620_v22  ;;  %p779_p10 = pnand %p778_p9, %p772_p6 }
  0x7d   :  { %584 = vmatmul.mubr.msk.f32.gmra.mrb[2].mxu1 %vm134_vm0, %v239_v25  ;;  %623 = vmatpush3.bf16.msra.mxu0 %v620_v22 }
  0x7e   :  { %627 = vmatpush3.bf16.msra.mxu1 %v620_v22  ;;  %594 = vmatprep.mubr.msk.f32.mxu0 %vm134_vm0, %v352_v26 }
  0x7f   :  { %597 = vmatprep.mubr.msk.f32.mxu1 %vm134_vm0, %v354_v27 }
  0x80   :  { %595 = vmatmul.mubr.msk.f32.vlgmr.msra.gmra.mrb[4].mxu0 %vm134_vm0, %v353_v28 }
  0x81   :  { %598 = vmatmul.mubr.msk.f32.vlgmr.msra.gmra.mrb[4].mxu1 %vm134_vm0, %v355_v29 }
 0x14b   :  { %v568_v32 = vpop.f32.mrb[0].mxu0 }
 0x14c   :  { %v219_v33 = vadd.f32 %v568_v32, %v519_v30  ;;  %v582_v34 = vpop.f32.mrb[0].mxu1  ;;  %v213_v35 = vpop.f32.mrb[1].mxu0 }
 0x14d   :  { %v335_v36 = vadd.f32 %v582_v34, %v524_v31  ;;  %v214_v37 = vadd.f32 %v519_v30, %v213_v35  ;;  %v329_v38 = vpop.f32.mrb[1].mxu1 }
 0x14e   :  { %233 = vst.msk [vmem:[#allocation13 + $0x8] sm:$0xff] %vm134_vm0, %v219_v33  ;;  %v330_v39 = vadd.f32 %v524_v31, %v329_v38 }
 0x14f   :  { %349 = vst.msk [vmem:[#allocation14 + $0x8] sm:$0xff] %vm134_vm0, %v335_v36  ;;  %232 = vst.msk [vmem:[#allocation13] sm:$0xff] %vm134_vm0, %v214_v37  ;;  %v571_v40 = vpop.f32.mrb[2].mxu0 }
 0x150   :  { %348 = vst.msk [vmem:[#allocation14] sm:$0xff] %vm134_vm0, %v330_v39  ;;  %v229_v41 = vadd.f32 %v571_v40, %v519_v30  ;;  %v585_v42 = vpop.f32.mrb[2].mxu1  ;;  %v223_v43 = vpop.f32.mrb[3].mxu0 }
 0x151   :  { %v345_v44 = vadd.f32 %v585_v42, %v524_v31  ;;  %v224_v45 = vadd.f32 %v519_v30, %v223_v43  ;;  %v339_v46 = vpop.f32.mrb[3].mxu1 }
 0x152   :  { %235 = vst.msk [vmem:[#allocation13 + $0x18] sm:$0xff] %vm134_vm0, %v229_v41  ;;  %v340_v48 = vadd.f32 %v524_v31, %v339_v46 }
 0x153   :  { %351 = vst.msk [vmem:[#allocation14 + $0x18] sm:$0xff] %vm134_vm0, %v345_v44  ;;  %234 = vst.msk [vmem:[#allocation13 + $0x10] sm:$0xff] %vm134_vm0, %v224_v45  ;;  %v596_v49 = vpop.f32.mrb[4].mxu0 }
 0x154   :  { %350 = vst.msk [vmem:[#allocation14 + $0x10] sm:$0xff] %vm134_vm0, %v340_v48  ;;  %v451_v50 = vadd.f32 %v596_v49, %v529_v47  ;;  %v599_v51 = vpop.f32.mrb[4].mxu1  ;;  %v445_v52 = vpop.f32.mrb[5].mxu0 }
 0x155   :  { %782 = shalt.err (!%p779_p10)
}
 0x156   :  { %s783_s23 = scalar_lea.hbm %s1128_s9, 512 }
 0x157   :  { %p784_p11 = scmp.ne.s32.totalorder %s1128_s9, %s783_s23  ;;  %p787_p12 = scmp.lt.u32.totalorder %s783_s23, %s1128_s9 }
 0x159   :  { %p789_p13 = pnand %p787_p12, %p784_p11 }
 0x15b   :  { %792 = shalt.err (!%p789_p13)
}
 0x15c   :  { %479 = dma.vmem_to_hbm [thread:$0]  %s474_s3, 512, %s1128_s9, [#allocation4], %s851_s29, %s851_s29, %s852_s30   ;;  %v461_v53 = vadd.f32 %v599_v51, %v529_v47  ;;  %v446_v54 = vadd.f32 %v529_v47, %v445_v52  ;;  %v455_v55 = vpop.f32.mrb[5].mxu1 }
 0x15d   :  { %s793_s25 = scalar_lea.vmem %s1057_s20, 512  ;;  %p798_p1 = scmp.lt.s32.totalorder %s1057_s20, %s1057_s20 }
 0x15e   :  { %p794_p0 = scmp.ne.s32.totalorder %s1057_s20, %s793_s25  ;;  %p799_p2 = scmp.lt.s32.totalorder %s793_s25, %s793_s25 }
 0x160   :  { %p800_p3 = por %p799_p2, %p798_p1 }
 0x162   :  { %p801_p4 = pnand %p800_p3, %p794_p0 }
 0x164   :  { %804 = shalt.err (!%p801_p4)
}
 0x165   :  { %s805_s13 = scalar_lea.hbm %s1129_s10, 512 }
 0x166   :  { %p806_p5 = scmp.ne.s32.totalorder %s1129_s10, %s805_s13  ;;  %p809_p6 = scmp.lt.u32.totalorder %s805_s13, %s1129_s10 }
 0x168   :  { %p811_p7 = pnand %p809_p6, %p806_p5 }
 0x16a   :  { %814 = shalt.err (!%p811_p7)
}
 0x16b   :  { %491 = dma.vmem_to_hbm [thread:$0]  %s1057_s20, 512, %s1129_s10, [#allocation15], %s851_s29, %s851_s29, %s852_s30   ;;  %465 = vst.msk [vmem:[#allocation16 + $0x8] sm:$0xff] %vm134_vm0, %v451_v50  ;;  %v456_v56 = vadd.f32 %v529_v47, %v455_v55  ;;  %467 = vst.msk [vmem:[#allocation16 + $0x18] sm:$0xff] %vm134_vm0, %v461_v53 }
 0x16c   :  { %464 = vst.msk [vmem:[#allocation16] sm:$0xff] %vm134_vm0, %v446_v54  ;;  %s815_s3 = scalar_lea.vmem %s498_s22, 512  ;;  %p820_p9 = scmp.lt.s32.totalorder %s498_s22, %s498_s22 }
 0x16d   :  { %466 = vst.msk [vmem:[#allocation16 + $0x10] sm:$0xff] %vm134_vm0, %v456_v56  ;;  %p816_p8 = scmp.ne.s32.totalorder %s498_s22, %s815_s3  ;;  %p821_p10 = scmp.lt.s32.totalorder %s815_s3, %s815_s3 }
 0x16f   :  { %p822_p11 = por %p821_p10, %p820_p9 }
 0x171   :  { %p823_p12 = pnand %p822_p11, %p816_p8 }
 0x173   :  { %826 = shalt.err (!%p823_p12)
}
 0x174   :  { %s827_s10 = scalar_lea.hbm %s1130_s11, 512 }
 0x175   :  { %p828_p13 = scmp.ne.s32.totalorder %s1130_s11, %s827_s10  ;;  %p831_p0 = scmp.lt.u32.totalorder %s827_s10, %s1130_s11 }
 0x177   :  { %p833_p1 = pnand %p831_p0, %p828_p13 }
 0x179   :  { %836 = shalt.err (!%p833_p1)
}
 0x17a   :  { %503 = dma.vmem_to_hbm [thread:$0]  %s498_s22, 512, %s1130_s11, [#allocation15], %s851_s29, %s851_s29, %s852_s30  }
 0x17b   :  { %845 = dma.done.wait [#allocation4], 512  }
 0x17c   :  { %846 = vsyncadd [#allocation4], 4294966784 }
 0x17d   :  { %847 = dma.done.wait [#allocation15], 1024  }
 0x17e   :  { %848 = vsyncadd [#allocation15], 4294966272 }
 0x17f   :  { %513 = vsyncpa [#allocation3], 1 }
 0x180   :  { %514 = vsyncpa [#allocation6], 1 }
 0x181   :  { %515 = vsyncpa [#allocation9], 1 }
 0x182   :  { %516 = vsyncpa [#allocation12], 1 }
 0x183   :  { %517 = vsyncpa [#allocation4], 1 }
 0x184   :  { %518 = vsyncpa [#allocation15], 1 }

</bundles_post_ra>
